<compile_context>
chip_gen: v7x
topology: tpu7x:2x2x1
jax: 0.10.0
libtpu: 0.0.40
codegen_flags: <defaults>
</compile_context>

<pallas_src>
import jax
import jax.numpy as jnp
from jax.experimental import pallas as pl
from jax.experimental.pallas import tpu as pltpu

NUM_LAYERS = 6
NUM_HIDDEN = NUM_LAYERS - 2          # the four identical (H, H) hidden layers

_BLOCK_CANDIDATES = (4096, 2048, 1024, 512, 256, 128, 64, 32, 16)


def _mlp_kernel(x_ref, w_in_ref, b_in_ref, w_hid_ref, b_hid_ref,
                w_out_ref, b_out_ref, o_ref):
    """One batch tile through the full fused 6-layer chain.

    Matmuls run on the MXU in the parameter dtype (bf16 by default) with f32
    accumulation; bias add and ReLU stay in f32.
    """
    h = x_ref[...]                                          # compute dtype
    # Layer 0: (block_b, P) @ (P, H)
    h = jnp.dot(h, w_in_ref[...], preferred_element_type=jnp.float32)
    h = jnp.maximum(h + b_in_ref[...], 0.0)
    # Layers 1..4: stacked (H, H) hidden layers, statically unrolled.
    for l in range(NUM_HIDDEN):
        w = w_hid_ref[l]                                    # (H, H)
        h = jnp.dot(h.astype(w.dtype), w, preferred_element_type=jnp.float32)
        h = jnp.maximum(h + b_hid_ref[l], 0.0)
    # Layer 5: (block_b, H) @ (H, C), no ReLU.
    w = w_out_ref[...]
    h = jnp.dot(h.astype(w.dtype), w, preferred_element_type=jnp.float32)
    o_ref[...] = (h + b_out_ref[...]).astype(o_ref.dtype)


def prepare_params(weights, biases, compute_dtype=jnp.bfloat16):
    """Cast + stack the Linear parameters ONCE, outside the per-call path.

    weights[i]: [in_i, out_i]  (PyTorch Linear.weight transposed)
    biases[i]:  [out_i]
    Returns (w_in (P,H), b_in (1,H) f32, w_hid (4,H,H), b_hid (4,1,H) f32,
             w_out (H,C), b_out (1,C) f32).
    """
    assert len(weights) == NUM_LAYERS and len(biases) == NUM_LAYERS
    H = weights[0].shape[1]
    C = weights[-1].shape[1]
    w_in = jnp.asarray(weights[0], dtype=compute_dtype)
    b_in = jnp.asarray(biases[0], dtype=jnp.float32).reshape(1, H)
    w_hid = jnp.stack([jnp.asarray(w, dtype=compute_dtype)
                       for w in weights[1:-1]])                 # (4, H, H)
    b_hid = jnp.stack([jnp.asarray(b, dtype=jnp.float32).reshape(1, H)
                       for b in biases[1:-1]])                  # (4, 1, H)
    w_out = jnp.asarray(weights[-1], dtype=compute_dtype)
    b_out = jnp.asarray(biases[-1], dtype=jnp.float32).reshape(1, C)
    return w_in, b_in, w_hid, b_hid, w_out, b_out


def _pick_block_b(B):
    # Largest aligned tile that still leaves >= 2 grid steps, so the batch
    # axis can shard across both v7x TensorCores and tiles stay big enough to
    # amortize per-step overhead on every generation.
    for cand in _BLOCK_CANDIDATES:
        if B % cand == 0 and B // cand >= 2:
            return cand
    return B     # tiny / odd batch: single grid step, full-array block


def _vmem_limit_bytes(block_b, P, H, C, n_hidden, in_bytes):
    # Actual footprint: double-buffered x / out tiles + params, plus a few
    # f32 activation slabs, with 2x margin.  Tight sizing (vs. a blanket
    # 48 MiB) keeps headroom on v7x (64 MiB physical per TC).
    x_tile = block_b * P * in_bytes
    o_tile = block_b * C * 4
    params = ((P * H + n_hidden * H * H + H * C) * in_bytes
              + (H + n_hidden * H + C) * 4)
    act = 3 * block_b * max(P, H) * 4
    est = 2 * (x_tile + o_tile + params) + act
    return int(min(48 * 2**20, max(16 * 2**20, 2 * est)))


def predictor_forward(x, params, *, block_b=None):
    """Forward pass of the PyTorch `Predictor` module.

    x:       [B, params_length]   (ideally already in the params' dtype)
    params:  output of prepare_params()
    returns: [B, code_length] float32
    """
    w_in, b_in, w_hid, b_hid, w_out, b_out = params
    B, P = x.shape
    H = w_in.shape[1]
    C = w_out.shape[1]
    n_hidden = w_hid.shape[0]
    compute_dtype = w_in.dtype

    if block_b is None:
        block_b = _pick_block_b(B)
    # Second-minor tiling constraint: the batch tile must be a multiple of
    # 8 (f32) / 16 (bf16) unless it spans the whole batch.
    row_align = 16 if jnp.dtype(compute_dtype).itemsize < 4 else 8
    assert B % block_b == 0, "batch must be divisible by the batch tile"
    assert block_b == B or block_b % row_align == 0, (
        "block_b must be a multiple of %d (or equal to B)" % row_align)

    # Only cast if the caller didn't already supply the compute dtype
    # (feeding bf16 x directly avoids an un-hidden XLA convert).
    x_c = x if x.dtype == compute_dtype else x.astype(compute_dtype)

    in_specs = [
        # x: batch-tiled; the only operand whose block changes per grid step.
        pl.BlockSpec((block_b, P), lambda i: (i, 0)),
        # Parameters: constant block index -> DMA'd once, VMEM-resident for
        # the whole grid.
        pl.BlockSpec((P, H), lambda i: (0, 0)),
        pl.BlockSpec((1, H), lambda i: (0, 0)),
        pl.BlockSpec((n_hidden, H, H), lambda i: (0, 0, 0)),
        pl.BlockSpec((n_hidden, 1, H), lambda i: (0, 0, 0)),
        pl.BlockSpec((H, C), lambda i: (0, 0)),
        pl.BlockSpec((1, C), lambda i: (0, 0)),
    ]

    out = pl.pallas_call(
        _mlp_kernel,
        out_shape=jax.ShapeDtypeStruct((B, C), jnp.float32),
        grid_spec=pltpu.PrefetchScalarGridSpec(
            num_scalar_prefetch=0,
            grid=(B // block_b,),
            in_specs=in_specs,
            # Output kept at its natural (block_b, C) shape — see header
            # comment for why the lane-dense repack / N=128 padding is a net
            # loss for this HBM-bound kernel.
            out_specs=pl.BlockSpec((block_b, C), lambda i: (i, 0)),
        ),
        compiler_params=pltpu.CompilerParams(
            # Independent batch tiles; with >= 2 grid steps both v7x
            # TensorCores get work (single-TC chips are unaffected).
            dimension_semantics=("parallel",),
            vmem_limit_bytes=_vmem_limit_bytes(
                block_b, P, H, C, n_hidden,
                jnp.dtype(compute_dtype).itemsize),
        ),
    )(x_c, w_in, b_in, w_hid, b_hid, w_out, b_out)
    return out


def _reference(x, weights, biases):
    h = x
    for i in range(NUM_LAYERS):
        h = h @ weights[i] + biases[i]
        if i < NUM_LAYERS - 1:
            h = jnp.maximum(h, 0.0)
    return h


if __name__ == "__main__":
    # Module-consistent small shapes:
    #   params_length=128, hidden_length=64, code_length=8, batch=256
    B, P, H, C = 256, 128, 64, 8
    dims = [P] + [H] * (NUM_LAYERS - 1) + [C]

    key = jax.random.PRNGKey(0)
    keys = jax.random.split(key, 2 * NUM_LAYERS + 1)

    x = jax.random.normal(keys[0], (B, P), dtype=jnp.float32)

    # PyTorch nn.Linear default init: U(-1/sqrt(fan_in), 1/sqrt(fan_in)).
    weights, biases = [], []
    for i in range(NUM_LAYERS):
        fan_in, fan_out = dims[i], dims[i + 1]
        bound = 1.0 / (fan_in ** 0.5)
        weights.append(jax.random.uniform(
            keys[1 + 2 * i], (fan_in, fan_out), jnp.float32, -bound, bound))
        biases.append(jax.random.uniform(
            keys[2 + 2 * i], (fan_out,), jnp.float32, -bound, bound))

    ref = _reference(x, weights, biases)

    # 1) f32 path: exact numerical check against the reference
    #    (block_b=128 -> grid=(2,) exercises the tiled/parallel path).
    params_f32 = prepare_params(weights, biases, compute_dtype=jnp.float32)
    out_f32 = jax.block_until_ready(
        predictor_forward(x, params_f32, block_b=128))
    assert out_f32.shape == (B, C)
    assert jnp.allclose(out_f32, ref, atol=1e-4, rtol=1e-4)

    # 2) default (bf16) path: x supplied in bf16 so no wrapper-side convert;
    #    f32 accumulation keeps the error small -> loose tolerance.
    params_bf16 = prepare_params(weights, biases)          # bf16 default
    out_bf16 = jax.block_until_ready(
        predictor_forward(x.astype(jnp.bfloat16), params_bf16))
    assert out_bf16.shape == (B, C)
    assert jnp.allclose(out_bf16, ref, atol=1e-1, rtol=5e-2)

    print("KERNEL_OK")
</pallas_src>

<mosaic_0001>
module attributes {stable_mosaic.version = 11 : i64} {
  func.func @_mlp_kernel(%arg0: i32, %arg1: memref<128x128xf32, #tpu.memory_space<vmem>>, %arg2: memref<128x64xf32, #tpu.memory_space<vmem>>, %arg3: memref<1x64xf32, #tpu.memory_space<vmem>>, %arg4: memref<4x64x64xf32, #tpu.memory_space<vmem>>, %arg5: memref<4x1x64xf32, #tpu.memory_space<vmem>>, %arg6: memref<64x8xf32, #tpu.memory_space<vmem>>, %arg7: memref<1x8xf32, #tpu.memory_space<vmem>>, %arg8: memref<128x8xf32, #tpu.memory_space<vmem>>) attributes {dimension_semantics = [#tpu.dimension_semantics<parallel>], iteration_bounds = array<i64: 2>, scalar_prefetch = 0 : i64, scratch_operands = 0 : i64, tpu.core_type = #tpu.core_type<tc>, window_params = [{transform_indices = @transform_0, window_bounds = array<i64: 128, 128>}, {pipeline_mode = #tpu.pipeline_mode<synchronous>, transform_indices = @transform_1, window_bounds = array<i64: 128, 64>}, {pipeline_mode = #tpu.pipeline_mode<synchronous>, transform_indices = @transform_2, window_bounds = array<i64: 1, 64>}, {pipeline_mode = #tpu.pipeline_mode<synchronous>, transform_indices = @transform_3, window_bounds = array<i64: 4, 64, 64>}, {pipeline_mode = #tpu.pipeline_mode<synchronous>, transform_indices = @transform_4, window_bounds = array<i64: 4, 1, 64>}, {pipeline_mode = #tpu.pipeline_mode<synchronous>, transform_indices = @transform_5, window_bounds = array<i64: 64, 8>}, {pipeline_mode = #tpu.pipeline_mode<synchronous>, transform_indices = @transform_6, window_bounds = array<i64: 1, 8>}, {transform_indices = @transform_7, window_bounds = array<i64: 128, 8>}]} {
    %c0 = arith.constant 0 : index
    %c0_0 = arith.constant 0 : index
    %0 = vector.load %arg1[%c0, %c0_0] : memref<128x128xf32, #tpu.memory_space<vmem>>, vector<128x128xf32>
    %c0_1 = arith.constant 0 : index
    %c0_2 = arith.constant 0 : index
    %1 = vector.load %arg2[%c0_1, %c0_2] : memref<128x64xf32, #tpu.memory_space<vmem>>, vector<128x64xf32>
    %cst = arith.constant dense<0.000000e+00> : vector<128x64xf32>
    %2 = tpu.matmul %0, %1, %cst {dimension_numbers = #tpu.dot_dimension_numbers<[1], [0], [0], [1], [0, 0, 1, 1], [], []>} : vector<128x128xf32>, vector<128x64xf32>, vector<128x64xf32> -> vector<128x64xf32>
    %c0_3 = arith.constant 0 : index
    %c0_4 = arith.constant 0 : index
    %3 = vector.load %arg3[%c0_3, %c0_4] : memref<1x64xf32, #tpu.memory_space<vmem>>, vector<1x64xf32>
    %4 = vector.broadcast %3 : vector<1x64xf32> to vector<128x64xf32>
    %5 = arith.addf %2, %4 : vector<128x64xf32>
    %cst_5 = arith.constant 0.000000e+00 : f32
    %6 = vector.broadcast %cst_5 : f32 to vector<128x64xf32>
    %7 = arith.maximumf %5, %6 : vector<128x64xf32>
    %c0_6 = arith.constant 0 : index
    %c0_7 = arith.constant 0 : index
    %c0_8 = arith.constant 0 : index
    %8 = vector.load %arg4[%c0_6, %c0_7, %c0_8] : memref<4x64x64xf32, #tpu.memory_space<vmem>>, vector<1x64x64xf32>
    %9 = vector.shape_cast %8 : vector<1x64x64xf32> to vector<64x64xf32>
    %cst_9 = arith.constant dense<0.000000e+00> : vector<128x64xf32>
    %10 = tpu.matmul %7, %9, %cst_9 {dimension_numbers = #tpu.dot_dimension_numbers<[1], [0], [0], [1], [0, 0, 1, 1], [], []>} : vector<128x64xf32>, vector<64x64xf32>, vector<128x64xf32> -> vector<128x64xf32>
    %c0_10 = arith.constant 0 : index
    %c0_11 = arith.constant 0 : index
    %c0_12 = arith.constant 0 : index
    %11 = vector.load %arg5[%c0_10, %c0_11, %c0_12] : memref<4x1x64xf32, #tpu.memory_space<vmem>>, vector<1x1x64xf32>
    %12 = vector.shape_cast %11 : vector<1x1x64xf32> to vector<1x64xf32>
    %13 = vector.broadcast %12 : vector<1x64xf32> to vector<128x64xf32>
    %14 = arith.addf %10, %13 : vector<128x64xf32>
    %cst_13 = arith.constant 0.000000e+00 : f32
    %15 = vector.broadcast %cst_13 : f32 to vector<128x64xf32>
    %16 = arith.maximumf %14, %15 : vector<128x64xf32>
    %c1 = arith.constant 1 : index
    %c0_14 = arith.constant 0 : index
    %c0_15 = arith.constant 0 : index
    %17 = vector.load %arg4[%c1, %c0_14, %c0_15] : memref<4x64x64xf32, #tpu.memory_space<vmem>>, vector<1x64x64xf32>
    %18 = vector.shape_cast %17 : vector<1x64x64xf32> to vector<64x64xf32>
    %cst_16 = arith.constant dense<0.000000e+00> : vector<128x64xf32>
    %19 = tpu.matmul %16, %18, %cst_16 {dimension_numbers = #tpu.dot_dimension_numbers<[1], [0], [0], [1], [0, 0, 1, 1], [], []>} : vector<128x64xf32>, vector<64x64xf32>, vector<128x64xf32> -> vector<128x64xf32>
    %c1_17 = arith.constant 1 : index
    %c0_18 = arith.constant 0 : index
    %c0_19 = arith.constant 0 : index
    %20 = vector.load %arg5[%c1_17, %c0_18, %c0_19] : memref<4x1x64xf32, #tpu.memory_space<vmem>>, vector<1x1x64xf32>
    %21 = vector.shape_cast %20 : vector<1x1x64xf32> to vector<1x64xf32>
    %22 = vector.broadcast %21 : vector<1x64xf32> to vector<128x64xf32>
    %23 = arith.addf %19, %22 : vector<128x64xf32>
    %cst_20 = arith.constant 0.000000e+00 : f32
    %24 = vector.broadcast %cst_20 : f32 to vector<128x64xf32>
    %25 = arith.maximumf %23, %24 : vector<128x64xf32>
    %c2 = arith.constant 2 : index
    %c0_21 = arith.constant 0 : index
    %c0_22 = arith.constant 0 : index
    %26 = vector.load %arg4[%c2, %c0_21, %c0_22] : memref<4x64x64xf32, #tpu.memory_space<vmem>>, vector<1x64x64xf32>
    %27 = vector.shape_cast %26 : vector<1x64x64xf32> to vector<64x64xf32>
    %cst_23 = arith.constant dense<0.000000e+00> : vector<128x64xf32>
    %28 = tpu.matmul %25, %27, %cst_23 {dimension_numbers = #tpu.dot_dimension_numbers<[1], [0], [0], [1], [0, 0, 1, 1], [], []>} : vector<128x64xf32>, vector<64x64xf32>, vector<128x64xf32> -> vector<128x64xf32>
    %c2_24 = arith.constant 2 : index
    %c0_25 = arith.constant 0 : index
    %c0_26 = arith.constant 0 : index
    %29 = vector.load %arg5[%c2_24, %c0_25, %c0_26] : memref<4x1x64xf32, #tpu.memory_space<vmem>>, vector<1x1x64xf32>
    %30 = vector.shape_cast %29 : vector<1x1x64xf32> to vector<1x64xf32>
    %31 = vector.broadcast %30 : vector<1x64xf32> to vector<128x64xf32>
    %32 = arith.addf %28, %31 : vector<128x64xf32>
    %cst_27 = arith.constant 0.000000e+00 : f32
    %33 = vector.broadcast %cst_27 : f32 to vector<128x64xf32>
    %34 = arith.maximumf %32, %33 : vector<128x64xf32>
    %c3 = arith.constant 3 : index
    %c0_28 = arith.constant 0 : index
    %c0_29 = arith.constant 0 : index
    %35 = vector.load %arg4[%c3, %c0_28, %c0_29] : memref<4x64x64xf32, #tpu.memory_space<vmem>>, vector<1x64x64xf32>
    %36 = vector.shape_cast %35 : vector<1x64x64xf32> to vector<64x64xf32>
    %cst_30 = arith.constant dense<0.000000e+00> : vector<128x64xf32>
    %37 = tpu.matmul %34, %36, %cst_30 {dimension_numbers = #tpu.dot_dimension_numbers<[1], [0], [0], [1], [0, 0, 1, 1], [], []>} : vector<128x64xf32>, vector<64x64xf32>, vector<128x64xf32> -> vector<128x64xf32>
    %c3_31 = arith.constant 3 : index
    %c0_32 = arith.constant 0 : index
    %c0_33 = arith.constant 0 : index
    %38 = vector.load %arg5[%c3_31, %c0_32, %c0_33] : memref<4x1x64xf32, #tpu.memory_space<vmem>>, vector<1x1x64xf32>
    %39 = vector.shape_cast %38 : vector<1x1x64xf32> to vector<1x64xf32>
    %40 = vector.broadcast %39 : vector<1x64xf32> to vector<128x64xf32>
    %41 = arith.addf %37, %40 : vector<128x64xf32>
    %cst_34 = arith.constant 0.000000e+00 : f32
    %42 = vector.broadcast %cst_34 : f32 to vector<128x64xf32>
    %43 = arith.maximumf %41, %42 : vector<128x64xf32>
    %c0_35 = arith.constant 0 : index
    %c0_36 = arith.constant 0 : index
    %44 = vector.load %arg6[%c0_35, %c0_36] : memref<64x8xf32, #tpu.memory_space<vmem>>, vector<64x8xf32>
    %cst_37 = arith.constant dense<0.000000e+00> : vector<128x8xf32>
    %45 = tpu.matmul %43, %44, %cst_37 {dimension_numbers = #tpu.dot_dimension_numbers<[1], [0], [0], [1], [0, 0, 1, 1], [], []>} : vector<128x64xf32>, vector<64x8xf32>, vector<128x8xf32> -> vector<128x8xf32>
    %c0_38 = arith.constant 0 : index
    %c0_39 = arith.constant 0 : index
    %46 = vector.load %arg7[%c0_38, %c0_39] : memref<1x8xf32, #tpu.memory_space<vmem>>, vector<1x8xf32>
    %47 = vector.broadcast %46 : vector<1x8xf32> to vector<128x8xf32>
    %48 = arith.addf %45, %47 : vector<128x8xf32>
    %c0_40 = arith.constant 0 : index
    %c0_41 = arith.constant 0 : index
    %49 = vector.load %arg8[%c0_40, %c0_41] : memref<128x8xf32, #tpu.memory_space<vmem>>, vector<128x8xf32>
    tpu.vector_store %arg8[%c0_40, %c0_41], %48 {strides = array<i32>} : memref<128x8xf32, #tpu.memory_space<vmem>>, vector<128x8xf32>,
    return
  }
  func.func @transform_0(%arg0: i32) -> (i32, i32) {
    %c0_i32 = arith.constant 0 : i32
    %c0_i32_0 = arith.constant 0 : i32
    return %arg0, %c0_i32 : i32, i32
  }
  func.func @transform_1(%arg0: i32) -> (i32, i32) {
    %c0_i32 = arith.constant 0 : i32
    %c0_i32_0 = arith.constant 0 : i32
    %c0_i32_1 = arith.constant 0 : i32
    return %c0_i32, %c0_i32_0 : i32, i32
  }
  func.func @transform_2(%arg0: i32) -> (i32, i32) {
    %c0_i32 = arith.constant 0 : i32
    %c0_i32_0 = arith.constant 0 : i32
    %c0_i32_1 = arith.constant 0 : i32
    return %c0_i32, %c0_i32_0 : i32, i32
  }
  func.func @transform_3(%arg0: i32) -> (i32, i32, i32) {
    %c0_i32 = arith.constant 0 : i32
    %c0_i32_0 = arith.constant 0 : i32
    %c0_i32_1 = arith.constant 0 : i32
    %c0_i32_2 = arith.constant 0 : i32
    return %c0_i32, %c0_i32_0, %c0_i32_1 : i32, i32, i32
  }
  func.func @transform_4(%arg0: i32) -> (i32, i32, i32) {
    %c0_i32 = arith.constant 0 : i32
    %c0_i32_0 = arith.constant 0 : i32
    %c0_i32_1 = arith.constant 0 : i32
    %c0_i32_2 = arith.constant 0 : i32
    return %c0_i32, %c0_i32_0, %c0_i32_1 : i32, i32, i32
  }
  func.func @transform_5(%arg0: i32) -> (i32, i32) {
    %c0_i32 = arith.constant 0 : i32
    %c0_i32_0 = arith.constant 0 : i32
    %c0_i32_1 = arith.constant 0 : i32
    return %c0_i32, %c0_i32_0 : i32, i32
  }
  func.func @transform_6(%arg0: i32) -> (i32, i32) {
    %c0_i32 = arith.constant 0 : i32
    %c0_i32_0 = arith.constant 0 : i32
    %c0_i32_1 = arith.constant 0 : i32
    return %c0_i32, %c0_i32_0 : i32, i32
  }
  func.func @transform_7(%arg0: i32) -> (i32, i32) {
    %c0_i32 = arith.constant 0 : i32
    %c0_i32_0 = arith.constant 0 : i32
    return %arg0, %c0_i32 : i32, i32
  }
}

</mosaic_0001>

<bundles_post_ra>
// kernel: tpu_custom_call.1
= control target key start
LH: loop header
LB: loop body
LE: loop exit
PB: predicated region body
PF: predicated region fallthrough
CT: control target
= control target key end

     0   :  { %12 = vsyncpa [#allocation3], 0  ;;  %s2427_s24 = smov 0   ;;  %s2751_s0 = inlined_call_operand.vmem [shape: f32[256,128], index: 0, kind: input, shape index: {}]   ;;  %s2752_s1 = inlined_call_operand.vmem [shape: f32[128,64], index: 1, kind: input, shape index: {}]   ;;  %s2753_s2 = inlined_call_operand.vmem [shape: f32[1,64], index: 2, kind: input, shape index: {}]   ;;  %s2754_s3 = inlined_call_operand.hbm [shape: f32[4,64,64], index: 3, kind: input, shape index: {}]   ;;  %s2755_s4 = inlined_call_operand.vmem [shape: f32[4,1,64], index: 4, kind: input, shape index: {}]   ;;  %s2756_s5 = inlined_call_operand.vmem [shape: f32[64,8], index: 5, kind: input, shape index: {}]   ;;  %s2757_s6 = inlined_call_operand.vmem [shape: f32[1,8], index: 6, kind: input, shape index: {}]   ;;  %s2758_s7 = inlined_call_operand.vmem [shape: f32[256,8], index: 7, kind: output, shape index: {}]  }
   0x1 LB: > { %s1693_s25 = sadd.s32 4294967295, %s2382_s24   ;;  %p1695_p0 = scmp.ge.s32.totalorder %s2382_s24, 1  ;;  %s2382_s24 = sphi %s2427_s24, %s18_s24  }
   0x2   : > { %p201_p1 = scmp.lt.s32.totalorder %s2382_s24, 3  ;;  %s2384_s26 = smov [#allocation2]  }
   0x3   : > { %s219_s27 = sshll.u32 %s2384_s26, 4  ;;  %p2441_p3 = scmp.eq.s32.totalorder %s1693_s25, 0  ;;  %s220_s27 = int_to_ptr.vmem [resolvable:$true] %s219_s27 }
   0x4   : > { %p2435_p2 = pnand %p1695_p0, %p201_p1  ;;  %s2344_s10 = scalar_lea.hbm %s2754_s3, 4096 }
   0x5   : > { %s2763_s29 = scalar_select %p2441_p3, 1, 0 }
   0x6   : > { %s2762_s28 = scalar_select %p2435_p2, 1, 0 }
   0x7   : > { %p2327_p4 = pneg %p2435_p2  ;;  %p2345_p6 = scmp.ne.s32.totalorder %s2754_s3, %s2344_s10 }
   0x8   : > { %p2351_p10 = scmp.lt.u32.totalorder %s2344_s10, %s2754_s3 }
   0x9   : > { %p2449_p5 = pnand %p2441_p3, %p2327_p4 }
   0xb   : > { %p2346_p7 = pneg %p2449_p5 }
   0xd   : > { %p2347_p8 = pnand %p2346_p7, %p2345_p6 }
   0xf   : > { %p2348_p9 = pneg %p2347_p8 }
  0x11   : > { %p2353_p11 = pnand %p2351_p10, %p2348_p9 }
  0x13   : > { %2356 = shalt.err (!%p2353_p11)
}
  0x14   : > { %s2357_s15 = scalar_lea.vmem %s220_s27, 4096  ;;  %p2365_p1 = scmp.lt.s32.totalorder %s220_s27, %s220_s27 }
  0x15   : > { %p2358_p12 = scmp.ne.s32.totalorder %s220_s27, %s2357_s15  ;;  %p2366_p4 = scmp.lt.s32.totalorder %s2357_s15, %s2357_s15 }
  0x17   : > { %p2360_p13 = pnand %p2358_p12, %p2346_p7  ;;  %p2367_p3 = por %p2366_p4, %p2365_p1 }
  0x19   : > { %p2361_p0 = pneg %p2360_p13 }
  0x1b   : > { %p2368_p2 = pnand %p2367_p3, %p2361_p0 }
  0x1d   : > { %2371 = shalt.err (!%p2368_p2)
}
  0x1e   : > { %s2385_s16 = smov 128   ;;  %s2386_s17 = smov 8  }
  0x1f   : > { %2330 = dma.hbm_to_vmem [thread:$0]  (!%p2449_p5), %s2754_s3, 4096, %s220_s27, [#allocation3], %s2385_s16, %s2385_s16, %s2386_s17  }
  0x20   : > { %p2765_p6 = scmp.ne.s32.totalorder %s2762_s28, 0 }
  0x21   : > { %p2766_p8 = scmp.ne.s32.totalorder (!%p2765_p6), %s2763_s29, 0 }
  0x22   : > { %253 = sbr.rel (%p2765_p6) target bundleno = 1411 (0x583), region = 48 }
  0x29   : > { %2377 = dma.done.wait (%p2766_p8), [#allocation3], 4096  }
  0x2a   : > { %2379 = vsyncadd (%p2766_p8), [#allocation3], 4294963200  ;;  %s1700_s20 = sshll.u32 %s1693_s25, 4  ;;  %v313_v0 = vld [vmem:[%s2752_s1] sm:$0xff]  ;;  %v314_v1 = vld [vmem:[%s2752_s1 + $0x8] sm:$0xff]  ;;  %vm512_vm0 = vcmask 523264  }
  0x2b   : > { %p286_p2 = scmp.lt.s32.totalorder %s1700_s20, 31  ;;  %v315_v2 = vld [vmem:[%s2752_s1 + $0x10] sm:$0xff]  ;;  %v2203_v3 = vpack.c.bf16 %v314_v1, %v313_v0  ;;  %v316_v4 = vld [vmem:[%s2752_s1 + $0x18] sm:$0xff]  ;;  %v317_v6 = vld [vmem:[%s2752_s1 + $0x20] sm:$0xff]  ;;  %vm1608_vm1 = vcmask 64512  }
  0x2c   : > { %v2207_v5 = vpack.c.bf16 %v316_v4, %v315_v2  ;;  %v318_v7 = vld [vmem:[%s2752_s1 + $0x28] sm:$0xff]  ;;  %v319_v10 = vld [vmem:[%s2752_s1 + $0x30] sm:$0xff]  ;;  %v320_v11 = vld [vmem:[%s2752_s1 + $0x38] sm:$0xff] }
  0x2d   : > { %s2768_s20 = smov (!%p286_p2, %s1700_s20), 31  ;;  %2204 = vmatprep.subr.bf16.mxu0 %v2203_v3  ;;  %v2211_v8 = vpack.c.bf16 %v318_v7, %v317_v6  ;;  %v2215_v12 = vpack.c.bf16 %v320_v11, %v319_v10  ;;  %v321_v13 = vld [vmem:[%s2752_s1 + $0x40] sm:$0xff]  ;;  %v322_v14 = vld [vmem:[%s2752_s1 + $0x48] sm:$0xff]  ;;  %v499_v17 = vld [vmem:[#allocation2 + $0x10] sm:$0xff] }
  0x2e   : > { %s1701_s21 = sshll.u32 %s2768_s20, 3  ;;  %2206 = vmatpush3.bf16.msra.mxu0 %v2203_v3  ;;  %v497_v15 = vld [vmem:[#allocation2] sm:$0xff]  ;;  %v498_v16 = vld [vmem:[#allocation2 + $0x8] sm:$0xff]  ;;  %v500_v18 = vld [vmem:[#allocation2 + $0x18] sm:$0xff]  ;;  %v2219_v21 = vpack.c.bf16 %v322_v14, %v321_v13 }
  0x2f   : > { %s2503_s14 = scalar_lea.vmem %s2751_s0, %s1701_s21  ;;  %2208 = vmatprep.subr.bf16.mxu0 %v2207_v5  ;;  %v2235_v19 = vpack.c.bf16 %v498_v16, %v497_v15  ;;  %v2239_v20 = vpack.c.bf16 %v500_v18, %v499_v17  ;;  %v501_v22 = vld [vmem:[#allocation2 + $0x20] sm:$0xff]  ;;  %v502_v23 = vld [vmem:[#allocation2 + $0x28] sm:$0xff]  ;;  %v323_v24 = vld [vmem:[%s2752_s1 + $0x50] sm:$0xff]  ;;  %s2714_s29 = scalar_lea.vmem %s2758_s7, %s1701_s21 }
  0x30   : > { %v297_v9 = vld [vmem:[%s2503_s14] sm:$0xff]  ;;  %v324_v25 = vld [vmem:[%s2752_s1 + $0x58] sm:$0xff]  ;;  %v2243_v26 = vpack.c.bf16 %v502_v23, %v501_v22  ;;  %v326_v29 = vld [vmem:[%s2752_s1 + $0x68] sm:$0xff] }
  0x31   : > { %1979 = vmatprep.mubr.f32.mxu0 %v297_v9  ;;  %2236 = vmatprep.subr.bf16.mxu1 %v2235_v19  ;;  %v2223_v27 = vpack.c.bf16 %v324_v25, %v323_v24  ;;  %v325_v28 = vld [vmem:[%s2752_s1 + $0x60] sm:$0xff]  ;;  %v327_v31 = vld [vmem:[%s2752_s1 + $0x70] sm:$0xff]  ;;  %v328_v32 = vld [vmem:[%s2752_s1 + $0x78] sm:$0xff] }
  0x32   : > { %2210 = vmatpush3.bf16.msra.mxu0 %v2207_v5  ;;  %2238 = vmatpush3.bf16.msra.mxu1 %v2235_v19  ;;  %v2227_v30 = vpack.c.bf16 %v326_v29, %v325_v28  ;;  %v2231_v33 = vpack.c.bf16 %v328_v32, %v327_v31  ;;  %v298_v34 = vld [vmem:[%s2503_s14 + $0x8] sm:$0xff]  ;;  %v299_v35 = vld [vmem:[%s2503_s14 + $0x10] sm:$0xff]  ;;  %v300_v36 = vld [vmem:[%s2503_s14 + $0x18] sm:$0xff] }
  0x33   : > { %2212 = vmatprep.subr.bf16.mxu0 %v2211_v8  ;;  %2240 = vmatprep.subr.bf16.mxu1 %v2239_v20  ;;  %v301_v37 = vld [vmem:[%s2503_s14 + $0x20] sm:$0xff]  ;;  %v302_v38 = vld [vmem:[%s2503_s14 + $0x28] sm:$0xff]  ;;  %v303_v39 = vld [vmem:[%s2503_s14 + $0x30] sm:$0xff] }
  0x34   : > { %v304_v40 = vld [vmem:[%s2503_s14 + $0x38] sm:$0xff]  ;;  %v305_v41 = vld [vmem:[%s2503_s14 + $0x40] sm:$0xff]  ;;  %v306_v42 = vld [vmem:[%s2503_s14 + $0x48] sm:$0xff] }
  0x35   : > { %v307_v43 = vld [vmem:[%s2503_s14 + $0x50] sm:$0xff]  ;;  %v308_v44 = vld [vmem:[%s2503_s14 + $0x58] sm:$0xff]  ;;  %v309_v45 = vld [vmem:[%s2503_s14 + $0x60] sm:$0xff] }
  0x36   : > { %2214 = vmatpush3.bf16.msra.mxu0 %v2211_v8  ;;  %2242 = vmatpush3.bf16.msra.mxu1 %v2239_v20  ;;  %v310_v46 = vld [vmem:[%s2503_s14 + $0x68] sm:$0xff]  ;;  %v311_v47 = vld [vmem:[%s2503_s14 + $0x70] sm:$0xff]  ;;  %v312_v48 = vld [vmem:[%s2503_s14 + $0x78] sm:$0xff] }
  0x37   : > { %2216 = vmatprep.subr.bf16.mxu0 %v2215_v12  ;;  %2244 = vmatprep.subr.bf16.mxu1 %v2243_v26  ;;  %v503_v49 = vld [vmem:[#allocation2 + $0x30] sm:$0xff]  ;;  %v504_v50 = vld [vmem:[#allocation2 + $0x38] sm:$0xff]  ;;  %v723_v52 = vld [vmem:[#allocation2 + $0x40] sm:$0xff] }
  0x38   : > { %v2247_v51 = vpack.c.bf16 %v504_v50, %v503_v49  ;;  %v724_v53 = vld [vmem:[#allocation2 + $0x48] sm:$0xff]  ;;  %v2554_v55 = vld [vmem:[%s2753_s2] ss:$0 sm:$0xff]  ;;  %v725_v60 = vld [vmem:[#allocation2 + $0x50] sm:$0xff] }
  0x39   : > { %v2251_v54 = vpack.c.bf16 %v724_v53, %v723_v52  ;;  %v726_v61 = vld [vmem:[#allocation2 + $0x58] sm:$0xff]  ;;  %v727_v5 = vld [vmem:[#allocation2 + $0x60] sm:$0xff]  ;;  %v728_v6 = vld [vmem:[#allocation2 + $0x68] sm:$0xff] }
  0x3a   : > { %2218 = vmatpush3.bf16.msra.mxu0 %v2215_v12  ;;  %2246 = vmatpush3.bf16.msra.mxu1 %v2243_v26  ;;  %v2255_v3 = vpack.c.bf16 %v726_v61, %v725_v60  ;;  %v2259_v12 = vpack.c.bf16 %v728_v6, %v727_v5  ;;  %v729_v14 = vld [vmem:[#allocation2 + $0x70] sm:$0xff]  ;;  %v730_v15 = vld [vmem:[#allocation2 + $0x78] sm:$0xff]  ;;  %v949_v49 = vld [vmem:[#allocation2 + $0x80] sm:$0xff] }
  0x3b   : > { %2220 = vmatprep.subr.bf16.mxu0 %v2219_v21  ;;  %2248 = vmatprep.subr.bf16.mxu1 %v2247_v51  ;;  %v950_v50 = vld [vmem:[#allocation2 + $0x88] sm:$0xff]  ;;  %v952_v53 = vld [vmem:[#allocation2 + $0x98] sm:$0xff]  ;;  %v1705_v61 = vld [vmem:[%s2755_s4] ss:$0 sm:$0xff] }
  0x3c   : > { %v2267_v52 = vpack.c.bf16 %v950_v50, %v949_v49  ;;  %v1178_v50 = vld [vmem:[#allocation2 + $0xd8] sm:$0xff] }
  0x3e   : > { %2222 = vmatpush3.bf16.msra.mxu0 %v2219_v21  ;;  %2250 = vmatpush3.bf16.msra.mxu1 %v2247_v51  ;;  %v2263_v21 = vpack.c.bf16 %v730_v15, %v729_v14  ;;  %v951_v51 = vld [vmem:[#allocation2 + $0x90] sm:$0xff] }
  0x3f   : > { %2224 = vmatprep.subr.bf16.mxu0 %v2223_v27  ;;  %2252 = vmatprep.subr.bf16.mxu1 %v2251_v54 }
  0x42   : > { %2226 = vmatpush3.bf16.msra.mxu0 %v2223_v27 }
  0x43   : > { %2228 = vmatprep.subr.bf16.mxu0 %v2227_v30 }
  0x46   : > { %2230 = vmatpush3.bf16.msra.mxu0 %v2227_v30 }
  0x47   : > { %2232 = vmatprep.subr.bf16.mxu0 %v2231_v33 }
  0x4a   : > { %2234 = vmatpush3.bf16.msra.mxu0 %v2231_v33 }
  0x4b   : > { %2268 = vmatprep.subr.bf16.mxu0 %v2267_v52 }
  0x4d   : > { %1980 = vmatmul.mubr.f32.vlgmr.msra.gmra.mrb[0].mxu0 %v298_v34 }
  0x4e   : > { %1982 = vmatprep.mubr.f32.mxu0 %v299_v35  ;;  %2270 = vmatpush3.bf16.msra.mxu0 %v2267_v52  ;;  %v1179_v52 = vld [vmem:[#allocation2 + $0xe0] sm:$0xff] }
  0x51   : > { %1983 = vmatmul.mubr.f32.gmra.mrb[2].mxu0 %v300_v36 }
  0x52   : > { %1985 = vmatprep.mubr.f32.mxu0 %v301_v37 }
  0x55   : > { %1986 = vmatmul.mubr.f32.gmra.mrb[4].mxu0 %v302_v38 }
  0x56   : > { %1988 = vmatprep.mubr.f32.mxu0 %v303_v39 }
  0x59   : > { %1989 = vmatmul.mubr.f32.gmra.mrb[6].mxu0 %v304_v40 }
  0x5a   : > { %1991 = vmatprep.mubr.f32.mxu0 %v305_v41 }
  0x5d   : > { %1992 = vmatmul.mubr.f32.gmra.mrb[8].mxu0 %v306_v42 }
  0x5e   : > { %1994 = vmatprep.mubr.f32.mxu0 %v307_v43 }
  0x61   : > { %1995 = vmatmul.mubr.f32.gmra.mrb[10].mxu0 %v308_v44 }
  0x62   : > { %1997 = vmatprep.mubr.f32.mxu0 %v309_v45 }
  0x65   : > { %1998 = vmatmul.mubr.f32.gmra.mrb[12].mxu0 %v310_v46 }
  0x66   : > { %2000 = vmatprep.mubr.f32.mxu0 %v311_v47 }
  0x69   : > { %2001 = vmatmul.mubr.f32.gmra.mrb[14].mxu0 %v312_v48 }
 0x120   : > { %v1981_v56 = vpop.f32.mrb[0].mxu0 }
 0x121   : > { %v408_v57 = vadd.f32 %v1981_v56, %v2554_v55  ;;  %v402_v58 = vpop.f32.mrb[1].mxu0  ;;  %v953_v56 = vld [vmem:[#allocation2 + $0xa0] sm:$0xff] }
 0x122   : > { %v403_v59 = vadd.f32 %v2554_v55, %v402_v58  ;;  %v955_v58 = vld [vmem:[#allocation2 + $0xb0] sm:$0xff] }
 0x123   : > { %v482_v0 = vmax.f32 %v408_v57, 0.0  ;;  %v954_v57 = vld [vmem:[#allocation2 + $0xa8] sm:$0xff] }
 0x124   : > { %v481_v62 = vmax.f32 %v403_v59, 0.0  ;;  %v1984_v63 = vpop.f32.mrb[2].mxu0  ;;  %v956_v59 = vld [vmem:[#allocation2 + $0xb8] sm:$0xff] }
 0x125   : > { %v418_v1 = vadd.f32 %v1984_v63, %v2554_v55  ;;  %v412_v2 = vpop.f32.mrb[3].mxu0  ;;  %v2279_v60 = vpack.c.bf16 %v956_v59, %v955_v58  ;;  %v1723_v58 = vld [vmem:[%s2755_s4 + $0x1] ss:$0 sm:$0xff] }
 0x126   : > { %v413_v4 = vadd.f32 %v2554_v55, %v412_v2  ;;  %2019 = vmatprep.mubr.msk.f32.mxu1 %vm512_vm0, %v481_v62 }
 0x127   : > { %2020 = vmatmul.mubr.msk.f32.vlgmr.msra.gmra.mrb[0].mxu1 %vm512_vm0, %v482_v0  ;;  %v484_v9 = vmax.f32 %v418_v1, 0.0 }
 0x128   : > { %v483_v7 = vmax.f32 %v413_v4, 0.0  ;;  %v1987_v8 = vpop.f32.mrb[4].mxu0  ;;  %2254 = vmatpush3.bf16.msra.mxu1 %v2251_v54  ;;  %v2271_v54 = vpack.c.bf16 %v952_v53, %v951_v51  ;;  %v1180_v53 = vld [vmem:[#allocation2 + $0xe8] sm:$0xff] }
 0x129   : > { %v428_v10 = vadd.f32 %v1987_v8, %v2554_v55  ;;  %v422_v11 = vpop.f32.mrb[5].mxu0  ;;  %2256 = vmatprep.subr.bf16.mxu1 %v2255_v3 }
 0x12a   : > { %v423_v13 = vadd.f32 %v2554_v55, %v422_v11  ;;  %2022 = vmatprep.mubr.msk.f32.mxu1 %vm512_vm0, %v483_v7  ;;  %2272 = vmatprep.subr.bf16.mxu0 %v2271_v54 }
 0x12b   : > { %2023 = vmatmul.mubr.msk.f32.gmra.mrb[2].mxu1 %vm512_vm0, %v484_v9  ;;  %v486_v18 = vmax.f32 %v428_v10, 0.0  ;;  %2274 = vmatpush3.bf16.msra.mxu0 %v2271_v54  ;;  %v2291_v54 = vpack.c.bf16 %v1180_v53, %v1179_v52  ;;  %v2647_v52 = vld [vmem:[%s2755_s4 + $0x2] ss:$0 sm:$0xff] }
 0x12c   : > { %v485_v16 = vmax.f32 %v423_v13, 0.0  ;;  %v1990_v17 = vpop.f32.mrb[6].mxu0  ;;  %2258 = vmatpush3.bf16.msra.mxu1 %v2255_v3 }
 0x12d   : > { %v438_v19 = vadd.f32 %v1990_v17, %v2554_v55  ;;  %v432_v20 = vpop.f32.mrb[7].mxu0  ;;  %2260 = vmatprep.subr.bf16.mxu1 %v2259_v12 }
 0x12e   : > { %v433_v22 = vadd.f32 %v2554_v55, %v432_v20  ;;  %2025 = vmatprep.mubr.msk.f32.mxu1 %vm512_vm0, %v485_v16 }
 0x12f   : > { %2026 = vmatmul.mubr.msk.f32.gmra.mrb[4].mxu1 %vm512_vm0, %v486_v18  ;;  %v488_v25 = vmax.f32 %v438_v19, 0.0 }
 0x130   : > { %v487_v23 = vmax.f32 %v433_v22, 0.0  ;;  %v1993_v24 = vpop.f32.mrb[8].mxu0  ;;  %2262 = vmatpush3.bf16.msra.mxu1 %v2259_v12 }
 0x131   : > { %v448_v26 = vadd.f32 %v1993_v24, %v2554_v55  ;;  %v442_v27 = vpop.f32.mrb[9].mxu0  ;;  %2264 = vmatprep.subr.bf16.mxu1 %v2263_v21 }
 0x132   : > { %v443_v28 = vadd.f32 %v2554_v55, %v442_v27  ;;  %2028 = vmatprep.mubr.msk.f32.mxu1 %vm512_vm0, %v487_v23 }
 0x133   : > { %2029 = vmatmul.mubr.msk.f32.gmra.mrb[6].mxu1 %vm512_vm0, %v488_v25  ;;  %v490_v31 = vmax.f32 %v448_v26, 0.0 }
 0x134   : > { %v489_v29 = vmax.f32 %v443_v28, 0.0  ;;  %v1996_v30 = vpop.f32.mrb[10].mxu0  ;;  %2266 = vmatpush3.bf16.msra.mxu1 %v2263_v21 }
 0x135   : > { %v458_v32 = vadd.f32 %v1996_v30, %v2554_v55  ;;  %v452_v33 = vpop.f32.mrb[11].mxu0 }
 0x136   : > { %v453_v34 = vadd.f32 %v2554_v55, %v452_v33  ;;  %2031 = vmatprep.mubr.msk.f32.mxu1 %vm512_vm0, %v489_v29 }
 0x137   : > { %2032 = vmatmul.mubr.msk.f32.gmra.mrb[8].mxu1 %vm512_vm0, %v490_v31  ;;  %v492_v37 = vmax.f32 %v458_v32, 0.0 }
 0x138   : > { %v491_v35 = vmax.f32 %v453_v34, 0.0  ;;  %v1999_v36 = vpop.f32.mrb[12].mxu0 }
 0x139   : > { %v468_v38 = vadd.f32 %v1999_v36, %v2554_v55  ;;  %v462_v39 = vpop.f32.mrb[13].mxu0 }
 0x13a   : > { %v463_v40 = vadd.f32 %v2554_v55, %v462_v39  ;;  %2034 = vmatprep.mubr.msk.f32.mxu1 %vm512_vm0, %v491_v35 }
 0x13b   : > { %2035 = vmatmul.mubr.msk.f32.gmra.mrb[10].mxu1 %vm512_vm0, %v492_v37  ;;  %v494_v43 = vmax.f32 %v468_v38, 0.0 }
 0x13c   : > { %v493_v41 = vmax.f32 %v463_v40, 0.0  ;;  %v2002_v42 = vpop.f32.mrb[14].mxu0 }
 0x13d   : > { %v478_v44 = vadd.f32 %v2002_v42, %v2554_v55  ;;  %v472_v45 = vpop.f32.mrb[15].mxu0 }
 0x13e   : > { %v473_v46 = vadd.f32 %v2554_v55, %v472_v45  ;;  %2037 = vmatprep.mubr.msk.f32.mxu1 %vm512_vm0, %v493_v41  ;;  %v2275_v55 = vpack.c.bf16 %v954_v57, %v953_v56  ;;  %v1181_v56 = vld [vmem:[#allocation2 + $0xf0] sm:$0xff]  ;;  %v1182_v57 = vld [vmem:[#allocation2 + $0xf8] sm:$0xff] }
 0x13f   : > { %2038 = vmatmul.mubr.msk.f32.gmra.mrb[12].mxu1 %vm512_vm0, %v494_v43  ;;  %v496_v48 = vmax.f32 %v478_v44, 0.0 }
 0x140   : > { %v495_v47 = vmax.f32 %v473_v46, 0.0  ;;  %2276 = vmatprep.subr.bf16.mxu0 %v2275_v55  ;;  %v1175_v46 = vld [vmem:[#allocation2 + $0xc0] sm:$0xff] }
 0x141   : > { %2278 = vmatpush3.bf16.msra.mxu0 %v2275_v55  ;;  %v2295_v55 = vpack.c.bf16 %v1182_v57, %v1181_v56 }
 0x142   : > { %2040 = vmatprep.mubr.msk.f32.mxu1 %vm512_vm0, %v495_v47  ;;  %2280 = vmatprep.subr.bf16.mxu0 %v2279_v60  ;;  %v1176_v47 = vld [vmem:[#allocation2 + $0xc8] sm:$0xff] }
 0x143   : > { %2041 = vmatmul.mubr.msk.f32.gmra.mrb[14].mxu1 %vm512_vm0, %v496_v48  ;;  %v1177_v48 = vld [vmem:[#allocation2 + $0xd0] sm:$0xff]  ;;  %v2283_v49 = vpack.c.bf16 %v1176_v47, %v1175_v46  ;;  %v1403_v47 = vld [vmem:[%s2756_s5 + $0x18] sm:$0xff] }
 0x144   : > { %v2287_v51 = vpack.c.bf16 %v1178_v50, %v1177_v48  ;;  %v1405_v50 = vld [vmem:[%s2756_s5 + $0x28] sm:$0xff] }
 0x145   : > { %2282 = vmatpush3.bf16.msra.mxu0 %v2279_v60  ;;  %2284 = vmatprep.subr.bf16.mxu1 %v2283_v49 }
 0x1fa   : > { %v2021_v62 = vpop.f32.mrb[0].mxu1 }
 0x1fb   : > { %v633_v63 = vadd.f32 %v2021_v62, %v1705_v61  ;;  %v627_v0 = vpop.f32.mrb[1].mxu1 }
 0x1fc   : > { %v628_v1 = vadd.f32 %v1705_v61, %v627_v0 }
 0x1fd   : > { %v707_v4 = vmax.f32 %v633_v63, 0.0 }
 0x1fe   : > { %v706_v2 = vmax.f32 %v628_v1, 0.0  ;;  %v2024_v3 = vpop.f32.mrb[2].mxu1 }
 0x1ff   : > { %v643_v5 = vadd.f32 %v2024_v3, %v1705_v61  ;;  %v637_v6 = vpop.f32.mrb[3].mxu1 }
 0x200   : > { %v638_v7 = vadd.f32 %v1705_v61, %v637_v6  ;;  %2059 = vmatprep.mubr.msk.f32.mxu1 %vm512_vm0, %v706_v2 }
 0x201   : > { %2060 = vmatmul.mubr.msk.f32.vlgmr.msra.gmra.mrb[16].mxu1 %vm512_vm0, %v707_v4  ;;  %v709_v10 = vmax.f32 %v643_v5, 0.0 }
 0x202   : > { %v708_v8 = vmax.f32 %v638_v7, 0.0  ;;  %v2027_v9 = vpop.f32.mrb[4].mxu1  ;;  %2286 = vmatpush3.bf16.msra.mxu1 %v2283_v49  ;;  %v1404_v49 = vld [vmem:[%s2756_s5 + $0x20] sm:$0xff] }
 0x203   : > { %v653_v11 = vadd.f32 %v2027_v9, %v1705_v61  ;;  %v647_v12 = vpop.f32.mrb[5].mxu1  ;;  %2288 = vmatprep.subr.bf16.mxu1 %v2287_v51 }
 0x204   : > { %v648_v13 = vadd.f32 %v1705_v61, %v647_v12  ;;  %2062 = vmatprep.mubr.msk.f32.mxu1 %vm512_vm0, %v708_v8 }
 0x205   : > { %2063 = vmatmul.mubr.msk.f32.gmra.mrb[18].mxu1 %vm512_vm0, %v709_v10  ;;  %v711_v16 = vmax.f32 %v653_v11, 0.0 }
 0x206   : > { %v710_v14 = vmax.f32 %v648_v13, 0.0  ;;  %v2030_v15 = vpop.f32.mrb[6].mxu1  ;;  %2290 = vmatpush3.bf16.msra.mxu1 %v2287_v51  ;;  %v2307_v51 = vpack.c.bf16 %v1405_v50, %v1404_v49 }
 0x207   : > { %v663_v17 = vadd.f32 %v2030_v15, %v1705_v61  ;;  %v657_v18 = vpop.f32.mrb[7].mxu1  ;;  %2292 = vmatprep.subr.bf16.mxu1 %v2291_v54 }
 0x208   : > { %v658_v19 = vadd.f32 %v1705_v61, %v657_v18  ;;  %2065 = vmatprep.mubr.msk.f32.mxu1 %vm512_vm0, %v710_v14 }
 0x209   : > { %2066 = vmatmul.mubr.msk.f32.gmra.mrb[20].mxu1 %vm512_vm0, %v711_v16  ;;  %v713_v22 = vmax.f32 %v663_v17, 0.0 }
 0x20a   : > { %v712_v20 = vmax.f32 %v658_v19, 0.0  ;;  %v2033_v21 = vpop.f32.mrb[8].mxu1  ;;  %2294 = vmatpush3.bf16.msra.mxu1 %v2291_v54 }
 0x20b   : > { %v673_v23 = vadd.f32 %v2033_v21, %v1705_v61  ;;  %v667_v24 = vpop.f32.mrb[9].mxu1  ;;  %2296 = vmatprep.subr.bf16.mxu1 %v2295_v55 }
 0x20c   : > { %v668_v25 = vadd.f32 %v1705_v61, %v667_v24  ;;  %2068 = vmatprep.mubr.msk.f32.mxu1 %vm512_vm0, %v712_v20 }
 0x20d   : > { %2069 = vmatmul.mubr.msk.f32.gmra.mrb[22].mxu1 %vm512_vm0, %v713_v22  ;;  %v715_v28 = vmax.f32 %v673_v23, 0.0 }
 0x20e   : > { %v714_v26 = vmax.f32 %v668_v25, 0.0  ;;  %v2036_v27 = vpop.f32.mrb[10].mxu1  ;;  %2298 = vmatpush3.bf16.msra.mxu1 %v2295_v55 }
 0x20f   : > { %v683_v29 = vadd.f32 %v2036_v27, %v1705_v61  ;;  %v677_v30 = vpop.f32.mrb[11].mxu1 }
 0x210   : > { %v678_v31 = vadd.f32 %v1705_v61, %v677_v30  ;;  %2071 = vmatprep.mubr.msk.f32.mxu1 %vm512_vm0, %v714_v26 }
 0x211   : > { %2072 = vmatmul.mubr.msk.f32.gmra.mrb[24].mxu1 %vm512_vm0, %v715_v28  ;;  %v717_v34 = vmax.f32 %v683_v29, 0.0 }
 0x212   : > { %v716_v32 = vmax.f32 %v678_v31, 0.0  ;;  %v2039_v33 = vpop.f32.mrb[12].mxu1 }
 0x213   : > { %v693_v35 = vadd.f32 %v2039_v33, %v1705_v61  ;;  %v687_v36 = vpop.f32.mrb[13].mxu1 }
 0x214   : > { %v688_v37 = vadd.f32 %v1705_v61, %v687_v36  ;;  %2074 = vmatprep.mubr.msk.f32.mxu1 %vm512_vm0, %v716_v32 }
 0x215   : > { %2075 = vmatmul.mubr.msk.f32.gmra.mrb[26].mxu1 %vm512_vm0, %v717_v34  ;;  %v719_v40 = vmax.f32 %v693_v35, 0.0 }
 0x216   : > { %v718_v38 = vmax.f32 %v688_v37, 0.0  ;;  %v2042_v39 = vpop.f32.mrb[14].mxu1 }
 0x217   : > { %v703_v41 = vadd.f32 %v2042_v39, %v1705_v61  ;;  %v697_v42 = vpop.f32.mrb[15].mxu1 }
 0x218   : > { %v698_v43 = vadd.f32 %v1705_v61, %v697_v42  ;;  %2077 = vmatprep.mubr.msk.f32.mxu1 %vm512_vm0, %v718_v38 }
 0x219   : > { %2078 = vmatmul.mubr.msk.f32.gmra.mrb[28].mxu1 %vm512_vm0, %v719_v40  ;;  %v721_v45 = vmax.f32 %v703_v41, 0.0 }
 0x21a   : > { %v720_v44 = vmax.f32 %v698_v43, 0.0  ;;  %v1400_v43 = vld [vmem:[%s2756_s5] sm:$0xff] }
 0x21c   : > { %2080 = vmatprep.mubr.msk.f32.mxu1 %vm512_vm0, %v720_v44  ;;  %v1401_v44 = vld [vmem:[%s2756_s5 + $0x8] sm:$0xff] }
 0x21d   : > { %2081 = vmatmul.mubr.msk.f32.gmra.mrb[30].mxu1 %vm512_vm0, %v721_v45  ;;  %v1402_v45 = vld [vmem:[%s2756_s5 + $0x10] sm:$0xff]  ;;  %v2299_v46 = vpack.c.bf16 %v1401_v44, %v1400_v43 }
 0x21e   : > { %v2303_v48 = vpack.c.bf16 %v1403_v47, %v1402_v45 }
 0x21f   : > { %2300 = vmatprep.subr.bf16.mxu0 %v2299_v46  ;;  %2315 = vmatprep.subr.bf16.mxu1 %v2299_v46 }
 0x2d4   : > { %v2061_v59 = vpop.f32.mrb[16].mxu1 }
 0x2d5   : > { %v859_v60 = vadd.f32 %v2061_v59, %v1723_v58  ;;  %v853_v61 = vpop.f32.mrb[17].mxu1 }
 0x2d6   : > { %v854_v62 = vadd.f32 %v1723_v58, %v853_v61 }
 0x2d7   : > { %v933_v1 = vmax.f32 %v859_v60, 0.0 }
 0x2d8   : > { %v932_v63 = vmax.f32 %v854_v62, 0.0  ;;  %v2064_v0 = vpop.f32.mrb[18].mxu1 }
 0x2d9   : > { %v869_v2 = vadd.f32 %v2064_v0, %v1723_v58  ;;  %v863_v3 = vpop.f32.mrb[19].mxu1 }
 0x2da   : > { %v864_v4 = vadd.f32 %v1723_v58, %v863_v3  ;;  %2099 = vmatprep.mubr.msk.f32.mxu0 %vm512_vm0, %v932_v63 }
 0x2db   : > { %2100 = vmatmul.mubr.msk.f32.vlgmr.msra.gmra.mrb[16].mxu0 %vm512_vm0, %v933_v1  ;;  %v935_v7 = vmax.f32 %v869_v2, 0.0 }
 0x2dc   : > { %v934_v5 = vmax.f32 %v864_v4, 0.0  ;;  %v2067_v6 = vpop.f32.mrb[20].mxu1  ;;  %2302 = vmatpush3.bf16.msra.mxu0 %v2299_v46 }
 0x2dd   : > { %v879_v8 = vadd.f32 %v2067_v6, %v1723_v58  ;;  %v873_v9 = vpop.f32.mrb[21].mxu1  ;;  %2304 = vmatprep.subr.bf16.mxu0 %v2303_v48 }
 0x2de   : > { %v874_v10 = vadd.f32 %v1723_v58, %v873_v9  ;;  %2102 = vmatprep.mubr.msk.f32.mxu0 %vm512_vm0, %v934_v5 }
 0x2df   : > { %2103 = vmatmul.mubr.msk.f32.gmra.mrb[18].mxu0 %vm512_vm0, %v935_v7  ;;  %v937_v13 = vmax.f32 %v879_v8, 0.0 }
 0x2e0   : > { %v936_v11 = vmax.f32 %v874_v10, 0.0  ;;  %v2070_v12 = vpop.f32.mrb[22].mxu1  ;;  %2306 = vmatpush3.bf16.msra.mxu0 %v2303_v48 }
 0x2e1   : > { %v889_v14 = vadd.f32 %v2070_v12, %v1723_v58  ;;  %v883_v15 = vpop.f32.mrb[23].mxu1  ;;  %2308 = vmatprep.subr.bf16.mxu0 %v2307_v51 }
 0x2e2   : > { %v884_v16 = vadd.f32 %v1723_v58, %v883_v15  ;;  %2105 = vmatprep.mubr.msk.f32.mxu0 %vm512_vm0, %v936_v11 }
 0x2e3   : > { %2106 = vmatmul.mubr.msk.f32.gmra.mrb[20].mxu0 %vm512_vm0, %v937_v13  ;;  %v939_v19 = vmax.f32 %v889_v14, 0.0 }
 0x2e4   : > { %v938_v17 = vmax.f32 %v884_v16, 0.0  ;;  %v2073_v18 = vpop.f32.mrb[24].mxu1  ;;  %2310 = vmatpush3.bf16.msra.mxu0 %v2307_v51 }
 0x2e5   : > { %v899_v20 = vadd.f32 %v2073_v18, %v1723_v58  ;;  %v893_v21 = vpop.f32.mrb[25].mxu1 }
 0x2e6   : > { %v894_v22 = vadd.f32 %v1723_v58, %v893_v21  ;;  %2108 = vmatprep.mubr.msk.f32.mxu0 %vm512_vm0, %v938_v17 }
 0x2e7   : > { %2109 = vmatmul.mubr.msk.f32.gmra.mrb[22].mxu0 %vm512_vm0, %v939_v19  ;;  %v941_v25 = vmax.f32 %v899_v20, 0.0 }
 0x2e8   : > { %v940_v23 = vmax.f32 %v894_v22, 0.0  ;;  %v2076_v24 = vpop.f32.mrb[26].mxu1 }
 0x2e9   : > { %v909_v26 = vadd.f32 %v2076_v24, %v1723_v58  ;;  %v903_v27 = vpop.f32.mrb[27].mxu1 }
 0x2ea   : > { %v904_v28 = vadd.f32 %v1723_v58, %v903_v27  ;;  %2111 = vmatprep.mubr.msk.f32.mxu0 %vm512_vm0, %v940_v23 }
 0x2eb   : > { %2112 = vmatmul.mubr.msk.f32.gmra.mrb[24].mxu0 %vm512_vm0, %v941_v25  ;;  %v943_v31 = vmax.f32 %v909_v26, 0.0 }
 0x2ec   : > { %v942_v29 = vmax.f32 %v904_v28, 0.0  ;;  %v2079_v30 = vpop.f32.mrb[28].mxu1 }
 0x2ed   : > { %v919_v32 = vadd.f32 %v2079_v30, %v1723_v58  ;;  %v913_v33 = vpop.f32.mrb[29].mxu1 }
 0x2ee   : > { %v914_v34 = vadd.f32 %v1723_v58, %v913_v33  ;;  %2114 = vmatprep.mubr.msk.f32.mxu0 %vm512_vm0, %v942_v29 }
 0x2ef   : > { %2115 = vmatmul.mubr.msk.f32.gmra.mrb[26].mxu0 %vm512_vm0, %v943_v31  ;;  %v945_v37 = vmax.f32 %v919_v32, 0.0 }
 0x2f0   : > { %v944_v35 = vmax.f32 %v914_v34, 0.0  ;;  %v2082_v36 = vpop.f32.mrb[30].mxu1 }
 0x2f1   : > { %v929_v38 = vadd.f32 %v2082_v36, %v1723_v58  ;;  %v923_v39 = vpop.f32.mrb[31].mxu1 }
 0x2f2   : > { %v924_v40 = vadd.f32 %v1723_v58, %v923_v39  ;;  %2117 = vmatprep.mubr.msk.f32.mxu0 %vm512_vm0, %v944_v35 }
 0x2f3   : > { %2118 = vmatmul.mubr.msk.f32.gmra.mrb[28].mxu0 %vm512_vm0, %v945_v37  ;;  %v947_v42 = vmax.f32 %v929_v38, 0.0  ;;  %v1406_v37 = vld [vmem:[%s2756_s5 + $0x30] sm:$0xff]  ;;  %v1407_v38 = vld [vmem:[%s2756_s5 + $0x38] sm:$0xff] }
 0x2f4   : > { %v946_v41 = vmax.f32 %v924_v40, 0.0  ;;  %v2311_v39 = vpack.c.bf16 %v1407_v38, %v1406_v37  ;;  %v1759_v40 = vld [vmem:[%s2755_s4 + $0x3] ss:$0 sm:$0xff] }
 0x2f6   : > { %2120 = vmatprep.mubr.msk.f32.mxu0 %vm512_vm0, %v946_v41  ;;  %2312 = vmatprep.subr.bf16.mxu0 %v2311_v39 }
 0x2f7   : > { %2121 = vmatmul.mubr.msk.f32.gmra.mrb[30].mxu0 %vm512_vm0, %v947_v42 }
 0x2f8   : > { %2314 = vmatpush3.bf16.msra.mxu0 %v2311_v39 }
 0x3ae   : > { %v2101_v53 = vpop.f32.mrb[16].mxu0 }
 0x3af   : > { %v1085_v54 = vadd.f32 %v2101_v53, %v2647_v52  ;;  %v1079_v56 = vpop.f32.mrb[17].mxu0 }
 0x3b0   : > { %v1080_v57 = vadd.f32 %v2647_v52, %v1079_v56 }
 0x3b1   : > { %v1159_v59 = vmax.f32 %v1085_v54, 0.0 }
 0x3b2   : > { %v1158_v55 = vmax.f32 %v1080_v57, 0.0  ;;  %v2104_v58 = vpop.f32.mrb[18].mxu0 }
 0x3b3   : > { %v1095_v60 = vadd.f32 %v2104_v58, %v2647_v52  ;;  %v1089_v61 = vpop.f32.mrb[19].mxu0 }
 0x3b4   : > { %v1090_v62 = vadd.f32 %v2647_v52, %v1089_v61  ;;  %2139 = vmatprep.mubr.msk.f32.mxu1 %vm512_vm0, %v1158_v55 }
 0x3b5   : > { %2140 = vmatmul.mubr.msk.f32.vlgmr.msra.gmra.mrb[32].mxu1 %vm512_vm0, %v1159_v59  ;;  %v1161_v1 = vmax.f32 %v1095_v60, 0.0 }
 0x3b6   : > { %v1160_v63 = vmax.f32 %v1090_v62, 0.0  ;;  %v2107_v0 = vpop.f32.mrb[20].mxu0  ;;  %2319 = vmatpush3.bf16.msra.mxu1 %v2299_v46 }
 0x3b7   : > { %v1105_v2 = vadd.f32 %v2107_v0, %v2647_v52  ;;  %v1099_v3 = vpop.f32.mrb[21].mxu0  ;;  %2316 = vmatprep.subr.bf16.mxu1 %v2303_v48 }
 0x3b8   : > { %v1100_v4 = vadd.f32 %v2647_v52, %v1099_v3  ;;  %2142 = vmatprep.mubr.msk.f32.mxu1 %vm512_vm0, %v1160_v63 }
 0x3b9   : > { %2143 = vmatmul.mubr.msk.f32.gmra.mrb[34].mxu1 %vm512_vm0, %v1161_v1  ;;  %v1163_v7 = vmax.f32 %v1105_v2, 0.0 }
 0x3ba   : > { %v1162_v5 = vmax.f32 %v1100_v4, 0.0  ;;  %v2110_v6 = vpop.f32.mrb[22].mxu0  ;;  %2320 = vmatpush3.bf16.msra.mxu1 %v2303_v48 }
 0x3bb   : > { %v1115_v8 = vadd.f32 %v2110_v6, %v2647_v52  ;;  %v1109_v9 = vpop.f32.mrb[23].mxu0  ;;  %2317 = vmatprep.subr.bf16.mxu1 %v2307_v51 }
 0x3bc   : > { %v1110_v10 = vadd.f32 %v2647_v52, %v1109_v9  ;;  %2145 = vmatprep.mubr.msk.f32.mxu1 %vm512_vm0, %v1162_v5 }
 0x3bd   : > { %2146 = vmatmul.mubr.msk.f32.gmra.mrb[36].mxu1 %vm512_vm0, %v1163_v7  ;;  %v1165_v13 = vmax.f32 %v1115_v8, 0.0 }
 0x3be   : > { %v1164_v11 = vmax.f32 %v1110_v10, 0.0  ;;  %v2113_v12 = vpop.f32.mrb[24].mxu0  ;;  %2321 = vmatpush3.bf16.msra.mxu1 %v2307_v51 }
 0x3bf   : > { %v1125_v14 = vadd.f32 %v2113_v12, %v2647_v52  ;;  %v1119_v15 = vpop.f32.mrb[25].mxu0  ;;  %2318 = vmatprep.subr.bf16.mxu1 %v2311_v39 }
 0x3c0   : > { %v1120_v16 = vadd.f32 %v2647_v52, %v1119_v15  ;;  %2148 = vmatprep.mubr.msk.f32.mxu1 %vm512_vm0, %v1164_v11 }
 0x3c1   : > { %2149 = vmatmul.mubr.msk.f32.gmra.mrb[38].mxu1 %vm512_vm0, %v1165_v13  ;;  %v1167_v19 = vmax.f32 %v1125_v14, 0.0 }
 0x3c2   : > { %v1166_v17 = vmax.f32 %v1120_v16, 0.0  ;;  %v2116_v18 = vpop.f32.mrb[26].mxu0  ;;  %2322 = vmatpush3.bf16.msra.mxu1 %v2311_v39 }
 0x3c3   : > { %v1135_v20 = vadd.f32 %v2116_v18, %v2647_v52  ;;  %v1129_v21 = vpop.f32.mrb[27].mxu0 }
 0x3c4   : > { %v1130_v22 = vadd.f32 %v2647_v52, %v1129_v21  ;;  %2151 = vmatprep.mubr.msk.f32.mxu1 %vm512_vm0, %v1166_v17 }
 0x3c5   : > { %2152 = vmatmul.mubr.msk.f32.gmra.mrb[40].mxu1 %vm512_vm0, %v1167_v19  ;;  %v1169_v25 = vmax.f32 %v1135_v20, 0.0 }
 0x3c6   : > { %v1168_v23 = vmax.f32 %v1130_v22, 0.0  ;;  %v2119_v24 = vpop.f32.mrb[28].mxu0 }
 0x3c7   : > { %v1145_v26 = vadd.f32 %v2119_v24, %v2647_v52  ;;  %v1139_v27 = vpop.f32.mrb[29].mxu0 }
 0x3c8   : > { %v1140_v28 = vadd.f32 %v2647_v52, %v1139_v27  ;;  %2154 = vmatprep.mubr.msk.f32.mxu1 %vm512_vm0, %v1168_v23 }
 0x3c9   : > { %2155 = vmatmul.mubr.msk.f32.gmra.mrb[42].mxu1 %vm512_vm0, %v1169_v25  ;;  %v1171_v31 = vmax.f32 %v1145_v26, 0.0  ;;  %v1776_v25 = vld [vmem:[%s2757_s6] ss:$0 sm:$0xff] }
 0x3ca   : > { %v1170_v29 = vmax.f32 %v1140_v28, 0.0  ;;  %v2122_v30 = vpop.f32.mrb[30].mxu0 }
 0x3cb   : > { %v1155_v32 = vadd.f32 %v2122_v30, %v2647_v52  ;;  %v1149_v33 = vpop.f32.mrb[31].mxu0 }
 0x3cc   : > { %v1150_v34 = vadd.f32 %v2647_v52, %v1149_v33  ;;  %2157 = vmatprep.mubr.msk.f32.mxu1 %vm512_vm0, %v1170_v29 }
 0x3cd   : > { %2158 = vmatmul.mubr.msk.f32.gmra.mrb[44].mxu1 %vm512_vm0, %v1171_v31  ;;  %v1173_v36 = vmax.f32 %v1155_v32, 0.0 }
 0x3ce   : > { %v1172_v35 = vmax.f32 %v1150_v34, 0.0 }
 0x3d0   : > { %2160 = vmatprep.mubr.msk.f32.mxu1 %vm512_vm0, %v1172_v35 }
 0x3d1   : > { %2161 = vmatmul.mubr.msk.f32.gmra.mrb[46].mxu1 %vm512_vm0, %v1173_v36 }
 0x488   : > { %v2141_v41 = vpop.f32.mrb[32].mxu1 }
 0x489   : > { %v1311_v42 = vadd.f32 %v2141_v41, %v1759_v40  ;;  %v1305_v43 = vpop.f32.mrb[33].mxu1 }
 0x48a   : > { %v1306_v44 = vadd.f32 %v1759_v40, %v1305_v43 }
 0x48b   : > { %v1385_v47 = vmax.f32 %v1311_v42, 0.0 }
 0x48c   : > { %v1384_v45 = vmax.f32 %v1306_v44, 0.0  ;;  %v2144_v46 = vpop.f32.mrb[34].mxu1 }
 0x48d   : > { %v1321_v48 = vadd.f32 %v2144_v46, %v1759_v40  ;;  %v1315_v49 = vpop.f32.mrb[35].mxu1 }
 0x48e   : > { %v1316_v50 = vadd.f32 %v1759_v40, %v1315_v49  ;;  %2179 = vmatprep.mubr.msk.f32.mxu0 %vm512_vm0, %v1384_v45 }
 0x48f   : > { %2180 = vmatmul.mubr.msk.f32.vlgmr.msra.gmra.mrb[32].mxu0 %vm512_vm0, %v1385_v47  ;;  %v1387_v53 = vmax.f32 %v1321_v48, 0.0 }
 0x490   : > { %v1386_v51 = vmax.f32 %v1316_v50, 0.0  ;;  %v2147_v52 = vpop.f32.mrb[36].mxu1 }
 0x491   : > { %v1331_v54 = vadd.f32 %v2147_v52, %v1759_v40  ;;  %v1325_v56 = vpop.f32.mrb[37].mxu1 }
 0x492   : > { %v1326_v57 = vadd.f32 %v1759_v40, %v1325_v56  ;;  %2182 = vmatprep.mubr.msk.f32.mxu0 %vm512_vm0, %v1386_v51 }
 0x493   : > { %2183 = vmatmul.mubr.msk.f32.gmra.mrb[34].mxu0 %vm512_vm0, %v1387_v53  ;;  %v1389_v59 = vmax.f32 %v1331_v54, 0.0 }
 0x494   : > { %v1388_v55 = vmax.f32 %v1326_v57, 0.0  ;;  %v2150_v58 = vpop.f32.mrb[38].mxu1 }
 0x495   : > { %v1341_v60 = vadd.f32 %v2150_v58, %v1759_v40  ;;  %v1335_v61 = vpop.f32.mrb[39].mxu1 }
 0x496   : > { %v1336_v62 = vadd.f32 %v1759_v40, %v1335_v61  ;;  %2185 = vmatprep.mubr.msk.f32.mxu0 %vm512_vm0, %v1388_v55 }
 0x497   : > { %2186 = vmatmul.mubr.msk.f32.gmra.mrb[36].mxu0 %vm512_vm0, %v1389_v59  ;;  %v1391_v1 = vmax.f32 %v1341_v60, 0.0 }
 0x498   : > { %v1390_v63 = vmax.f32 %v1336_v62, 0.0  ;;  %v2153_v0 = vpop.f32.mrb[40].mxu1 }
 0x499   : > { %v1351_v2 = vadd.f32 %v2153_v0, %v1759_v40  ;;  %v1345_v3 = vpop.f32.mrb[41].mxu1 }
 0x49a   : > { %v1346_v4 = vadd.f32 %v1759_v40, %v1345_v3  ;;  %2188 = vmatprep.mubr.msk.f32.mxu0 %vm512_vm0, %v1390_v63 }
 0x49b   : > { %2189 = vmatmul.mubr.msk.f32.gmra.mrb[38].mxu0 %vm512_vm0, %v1391_v1  ;;  %v1393_v7 = vmax.f32 %v1351_v2, 0.0 }
 0x49c   : > { %v1392_v5 = vmax.f32 %v1346_v4, 0.0  ;;  %v2156_v6 = vpop.f32.mrb[42].mxu1 }
 0x49d   : > { %v1361_v8 = vadd.f32 %v2156_v6, %v1759_v40  ;;  %v1355_v9 = vpop.f32.mrb[43].mxu1 }
 0x49e   : > { %v1356_v10 = vadd.f32 %v1759_v40, %v1355_v9  ;;  %2191 = vmatprep.mubr.msk.f32.mxu0 %vm512_vm0, %v1392_v5 }
 0x49f   : > { %2192 = vmatmul.mubr.msk.f32.gmra.mrb[40].mxu0 %vm512_vm0, %v1393_v7  ;;  %v1395_v13 = vmax.f32 %v1361_v8, 0.0 }
 0x4a0   : > { %v1394_v11 = vmax.f32 %v1356_v10, 0.0  ;;  %v2159_v12 = vpop.f32.mrb[44].mxu1 }
 0x4a1   : > { %v1371_v14 = vadd.f32 %v2159_v12, %v1759_v40  ;;  %v1365_v15 = vpop.f32.mrb[45].mxu1 }
 0x4a2   : > { %v1366_v16 = vadd.f32 %v1759_v40, %v1365_v15  ;;  %2194 = vmatprep.mubr.msk.f32.mxu0 %vm512_vm0, %v1394_v11 }
 0x4a3   : > { %2195 = vmatmul.mubr.msk.f32.gmra.mrb[42].mxu0 %vm512_vm0, %v1395_v13  ;;  %v1397_v19 = vmax.f32 %v1371_v14, 0.0 }
 0x4a4   : > { %v1396_v17 = vmax.f32 %v1366_v16, 0.0  ;;  %v2162_v18 = vpop.f32.mrb[46].mxu1 }
 0x4a5   : > { %v1381_v20 = vadd.f32 %v2162_v18, %v1759_v40  ;;  %v1375_v21 = vpop.f32.mrb[47].mxu1 }
 0x4a6   : > { %v1376_v22 = vadd.f32 %v1759_v40, %v1375_v21  ;;  %2197 = vmatprep.mubr.msk.f32.mxu1 %vm512_vm0, %v1396_v17 }
 0x4a7   : > { %2198 = vmatmul.mubr.msk.f32.vlgmr.msra.gmra.mrb[48].mxu1 %vm512_vm0, %v1397_v19  ;;  %v1399_v24 = vmax.f32 %v1381_v20, 0.0 }
 0x4a8   : > { %v1398_v23 = vmax.f32 %v1376_v22, 0.0 }
 0x4aa   : > { %2200 = vmatprep.mubr.msk.f32.mxu1 %vm512_vm0, %v1398_v23 }
 0x4ab   : > { %2201 = vmatmul.mubr.msk.f32.gmra.mrb[50].mxu1 %vm512_vm0, %v1399_v24 }
 0x562   : > { %v2181_v26 = vpop.f32.mrb[32].mxu0 }
 0x563   : > { %v1535_v27 = vadd.f32 %v2181_v26, %v1776_v25  ;;  %v1529_v28 = vpop.f32.mrb[33].mxu0 }
 0x564   : > { %v1530_v29 = vadd.f32 %v1776_v25, %v1529_v28 }
 0x565   : > { %1610 = vst.msk [vmem:[%s2714_s29 + $0x8] sm:$0xff] %vm1608_vm1, %v1535_v27 }
 0x566   : > { %1609 = vst.msk [vmem:[%s2714_s29] sm:$0xff] %vm1608_vm1, %v1530_v29  ;;  %v2184_v30 = vpop.f32.mrb[34].mxu0 }
 0x567   : > { %v1545_v31 = vadd.f32 %v2184_v30, %v1776_v25  ;;  %v1539_v32 = vpop.f32.mrb[35].mxu0 }
 0x568   : > { %v1540_v33 = vadd.f32 %v1776_v25, %v1539_v32 }
 0x569   : > { %1612 = vst.msk [vmem:[%s2714_s29 + $0x18] sm:$0xff] %vm1608_vm1, %v1545_v31 }
 0x56a   : > { %1611 = vst.msk [vmem:[%s2714_s29 + $0x10] sm:$0xff] %vm1608_vm1, %v1540_v33  ;;  %v2187_v34 = vpop.f32.mrb[36].mxu0 }
 0x56b   : > { %v1555_v35 = vadd.f32 %v2187_v34, %v1776_v25  ;;  %v1549_v36 = vpop.f32.mrb[37].mxu0 }
 0x56c   : > { %v1550_v37 = vadd.f32 %v1776_v25, %v1549_v36 }
 0x56d   : > { %1614 = vst.msk [vmem:[%s2714_s29 + $0x28] sm:$0xff] %vm1608_vm1, %v1555_v35 }
 0x56e   : > { %1613 = vst.msk [vmem:[%s2714_s29 + $0x20] sm:$0xff] %vm1608_vm1, %v1550_v37  ;;  %v2190_v38 = vpop.f32.mrb[38].mxu0 }
 0x56f   : > { %v1565_v39 = vadd.f32 %v2190_v38, %v1776_v25  ;;  %v1559_v40 = vpop.f32.mrb[39].mxu0 }
 0x570   : > { %v1560_v41 = vadd.f32 %v1776_v25, %v1559_v40 }
 0x571   : > { %1616 = vst.msk [vmem:[%s2714_s29 + $0x38] sm:$0xff] %vm1608_vm1, %v1565_v39 }
 0x572   : > { %1615 = vst.msk [vmem:[%s2714_s29 + $0x30] sm:$0xff] %vm1608_vm1, %v1560_v41  ;;  %v2193_v42 = vpop.f32.mrb[40].mxu0 }
 0x573   : > { %v1575_v43 = vadd.f32 %v2193_v42, %v1776_v25  ;;  %v1569_v44 = vpop.f32.mrb[41].mxu0 }
 0x574   : > { %v1570_v45 = vadd.f32 %v1776_v25, %v1569_v44 }
 0x575   : > { %1618 = vst.msk [vmem:[%s2714_s29 + $0x48] sm:$0xff] %vm1608_vm1, %v1575_v43 }
 0x576   : > { %1617 = vst.msk [vmem:[%s2714_s29 + $0x40] sm:$0xff] %vm1608_vm1, %v1570_v45  ;;  %v2196_v46 = vpop.f32.mrb[42].mxu0 }
 0x577   : > { %v1585_v47 = vadd.f32 %v2196_v46, %v1776_v25  ;;  %v1579_v48 = vpop.f32.mrb[43].mxu0 }
 0x578   : > { %v1580_v49 = vadd.f32 %v1776_v25, %v1579_v48 }
 0x579   : > { %1620 = vst.msk [vmem:[%s2714_s29 + $0x58] sm:$0xff] %vm1608_vm1, %v1585_v47 }
 0x57a   : > { %1619 = vst.msk [vmem:[%s2714_s29 + $0x50] sm:$0xff] %vm1608_vm1, %v1580_v49  ;;  %v2199_v50 = vpop.f32.mrb[48].mxu1 }
 0x57b   : > { %v1595_v51 = vadd.f32 %v2199_v50, %v1776_v25  ;;  %v1589_v52 = vpop.f32.mrb[49].mxu1 }
 0x57c   : > { %v1590_v53 = vadd.f32 %v1776_v25, %v1589_v52 }
 0x57d   : > { %1622 = vst.msk [vmem:[%s2714_s29 + $0x68] sm:$0xff] %vm1608_vm1, %v1595_v51 }
 0x57e   : > { %1621 = vst.msk [vmem:[%s2714_s29 + $0x60] sm:$0xff] %vm1608_vm1, %v1590_v53  ;;  %v2202_v54 = vpop.f32.mrb[50].mxu1 }
 0x57f   : > { %v1605_v56 = vadd.f32 %v2202_v54, %v1776_v25  ;;  %v1599_v57 = vpop.f32.mrb[51].mxu1 }
 0x580   : > { %v1600_v55 = vadd.f32 %v1776_v25, %v1599_v57 }
 0x581   : > { %1624 = vst.msk [vmem:[%s2714_s29 + $0x78] sm:$0xff] %vm1608_vm1, %v1605_v56 }
 0x582   : > { %1623 = vst.msk [vmem:[%s2714_s29 + $0x70] sm:$0xff] %vm1608_vm1, %v1600_v55 }
 0x583 PF: > { %s18_s24 = sadd.s32 1, %s2382_s24  }
 0x584   : > { %p15_p3 = scmp.ge.s32.totalorder %s18_s24, 4  }
 0x586   :  { %17 = sbr.rel (!%p15_p3) target bundleno = 1 (0x1), region = 89 }
 0x58d   :  { %1647 = vsyncpa [#allocation3], 1 }
 0x58e   :  { %1649 = vsyncpa [#allocation3 + $0x1], 1 }

</bundles_post_ra>
